<compile_context>
chip_gen: v5e
topology: v5e:2x2
jax: 0.10.0
libtpu: 0.0.40
codegen_flags: <defaults>
</compile_context>

<pallas_src>
import functools

import jax
import jax.numpy as jnp
from jax.experimental import pallas as pl
from jax.experimental.pallas import tpu as pltpu

_LANE = 128
_NEG_BIG = -1e30  # pad value for pred/time: exp underflows to 0, comparisons behave.
_MASK_TILE_BUDGET = 2 * 1024 * 1024  # max f32 elements for the (Bp, TI) mask tile (~8 MiB)


def survival_loss_kernel(t_col_ref, p_full_ref, p_tile_ref, t_tile_ref,
                         ind_tile_ref, out_ref, exp_row_ref, m_ref):
    step = pl.program_id(0)

    # Grid-invariant setup: accumulator, log-sum-exp shift, shifted exponentials.
    @pl.when(step == 0)
    def _init():
        out_ref[...] = jnp.zeros_like(out_ref)
        p_full = p_full_ref[...]                       # (1, Bp) f32
        m = jnp.max(p_full)                            # scalar shift
        m_ref[...] = jnp.full_like(m_ref, m)           # (1, 1) scratch
        exp_row_ref[...] = jnp.exp(p_full - m)         # (1, Bp); padded lanes -> 0

    m = m_ref[...]                                     # (1, 1)
    exp_row = exp_row_ref[...]                         # (1, Bp)

    t_col = t_col_ref[...]                             # (Bp, 1) f32 (column layout from wrapper)
    t_i = t_tile_ref[...]                              # (1, TI)
    # mask[j, i] = time[j] >= time[i]; padded j rows contribute 0 since exp_row[j] == 0.
    mask = (t_col >= t_i).astype(jnp.float32)          # (Bp, TI)

    # Masked exp-sum on the MXU: sums[i] = sum_j exp(pred[j] - m) * mask[j, i]
    sums = jnp.dot(exp_row, mask, preferred_element_type=jnp.float32)  # (1, TI)
    logsum = jnp.log(sums)                             # shifted log-sum (true logsum = m + logsum)

    p_i = p_tile_ref[...]                              # (1, TI)
    ind_i = ind_tile_ref[...]                          # (1, TI) in {0, 1} (0 on padding)
    # term_i = pred[i] - log(sum_j risk * exp(pred[j])) = (pred[i] - m) - logsum_shifted
    terms = jnp.where(ind_i > 0.5, (p_i - m) - logsum, 0.0)
    out_ref[...] += jnp.sum(terms)


@functools.partial(jax.jit, static_argnames=("tile",))
def survival_loss(pred, gt_indicator, gt_time, *, tile=256):
    """pred: (B, 1) or (B,) float; gt_indicator: (B,) bool/int; gt_time: (B,) float."""
    # TODO(synk): for tiny B (<= ~512) a fused pure-XLA implementation (survival_loss_ref)
    # avoids the kernel launch entirely; kept on the Pallas path here to exercise the kernel.
    B = pred.shape[0]
    b_round = pl.cdiv(B, _LANE) * _LANE
    # Event-index tile: multiple of 128, capped so the (Bp, TI) mask tile stays well in VMEM.
    ti_cap = max(_LANE, (_MASK_TILE_BUDGET // b_round) // _LANE * _LANE)
    ti = min(tile, b_round, ti_cap)
    b_pad = pl.cdiv(B, ti) * ti
    pad = b_pad - B
    num_tiles = b_pad // ti

    p = pred.reshape(1, B).astype(jnp.float32)
    t = gt_time.reshape(1, B).astype(jnp.float32)
    ind = gt_indicator.reshape(1, B).astype(jnp.float32)

    p_row = jnp.pad(p, ((0, 0), (0, pad)), constant_values=_NEG_BIG)
    t_row = jnp.pad(t, ((0, 0), (0, pad)), constant_values=_NEG_BIG)
    ind_row = jnp.pad(ind, ((0, 0), (0, pad)), constant_values=0.0)
    t_col = t_row.reshape(b_pad, 1)  # column layout for the "j" axis (no in-kernel transpose)

    num = pl.pallas_call(
        survival_loss_kernel,
        out_shape=jax.ShapeDtypeStruct((1, 1), jnp.float32),
        grid=(num_tiles,),
        in_specs=[
            pl.BlockSpec((b_pad, 1), lambda i: (0, 0)),   # time, column layout (fetched once)
            pl.BlockSpec((1, b_pad), lambda i: (0, 0)),   # pred, row layout (fetched once)
            pl.BlockSpec((1, ti), lambda i: (0, i)),      # pred tile over event index i
            pl.BlockSpec((1, ti), lambda i: (0, i)),      # time tile over event index i
            pl.BlockSpec((1, ti), lambda i: (0, i)),      # indicator tile over event index i
        ],
        out_specs=pl.BlockSpec((1, 1), lambda i: (0, 0)),  # resident accumulator
        scratch_shapes=[
            pltpu.VMEM((1, b_pad), jnp.float32),  # exp(pred - m), computed once on step 0
            pltpu.VMEM((1, 1), jnp.float32),      # log-sum-exp shift m
        ],
        compiler_params=pltpu.CompilerParams(
            dimension_semantics=("arbitrary",),
            vmem_limit_bytes=64 * 1024 * 1024,
        ),
    )(t_col, p_row, p_row, t_row, ind_row)

    n_events = jnp.sum(gt_indicator.astype(jnp.float32))
    return -(num[0, 0] / n_events)


def survival_loss_ref(pred, gt_indicator, gt_time):
    """Pure-JAX reference mirroring the PyTorch module exactly (via masking)."""
    p = pred.reshape(-1).astype(jnp.float32)
    ind = gt_indicator.astype(jnp.float32)
    t = gt_time.astype(jnp.float32)
    risk = (t[None, :] >= t[:, None]).astype(jnp.float32)
    m = jnp.max(p)
    logsum = m + jnp.log(jnp.sum(risk * jnp.exp(p - m)[None, :], axis=1))
    return -(jnp.sum(ind * (p - logsum)) / jnp.sum(ind))


if __name__ == "__main__":
    B = 8
    key = jax.random.PRNGKey(0)
    k_pred, k_time = jax.random.split(key)

    pred = jax.random.normal(k_pred, (B, 1), dtype=jnp.float32)           # risk scores
    gt_time = jax.random.uniform(k_time, (B,), minval=0.1, maxval=10.0)   # survival times
    gt_indicator = jnp.array([1, 0, 1, 1, 0, 1, 0, 1], dtype=bool)        # event indicators (>=1 event)

    loss = survival_loss(pred, gt_indicator, gt_time)
    loss = jax.block_until_ready(loss)

    ref = survival_loss_ref(pred, gt_indicator, gt_time)
    assert jnp.allclose(loss, ref, rtol=1e-5, atol=1e-5), (loss, ref)

    print("KERNEL_OK")
</pallas_src>

<mosaic_0001>
module attributes {stable_mosaic.version = 11 : i64} {
  func.func @survival_loss_kernel(%arg0: i32, %arg1: memref<128x1xf32, #tpu.memory_space<vmem>>, %arg2: memref<1x128xf32, #tpu.memory_space<vmem>>, %arg3: memref<1x128xf32, #tpu.memory_space<vmem>>, %arg4: memref<1x128xf32, #tpu.memory_space<vmem>>, %arg5: memref<1x128xf32, #tpu.memory_space<vmem>>, %arg6: memref<1x1xf32, #tpu.memory_space<vmem>>, %arg7: memref<1x128xf32, #tpu.memory_space<vmem>>, %arg8: memref<1x1xf32, #tpu.memory_space<vmem>>) attributes {dimension_semantics = [#tpu.dimension_semantics<arbitrary>], iteration_bounds = array<i64: 1>, scalar_prefetch = 0 : i64, scratch_operands = 2 : i64, tpu.core_type = #tpu.core_type<tc>, window_params = [{pipeline_mode = #tpu.pipeline_mode<synchronous>, transform_indices = @transform_0, window_bounds = array<i64: 128, 1>}, {pipeline_mode = #tpu.pipeline_mode<synchronous>, transform_indices = @transform_1, window_bounds = array<i64: 1, 128>}, {transform_indices = @transform_2, window_bounds = array<i64: 1, 128>}, {transform_indices = @transform_3, window_bounds = array<i64: 1, 128>}, {transform_indices = @transform_4, window_bounds = array<i64: 1, 128>}, {pipeline_mode = #tpu.pipeline_mode<synchronous>, transform_indices = @transform_5, window_bounds = array<i64: 1, 1>}]} {
    %c0_i32 = arith.constant 0 : i32
    %0 = arith.cmpi eq, %arg0, %c0_i32 : i32
    %1 = arith.extui %0 : i1 to i32
    %c0_i32_0 = arith.constant 0 : i32
    %2 = arith.cmpi ne, %1, %c0_i32_0 : i32
    scf.if %2 {
      %cst_19 = arith.constant 0.000000e+00 : f32
      %31 = vector.broadcast %cst_19 : f32 to vector<1x1xf32>
      %c0_20 = arith.constant 0 : index
      %c0_21 = arith.constant 0 : index
      %32 = vector.load %arg6[%c0_20, %c0_21] : memref<1x1xf32, #tpu.memory_space<vmem>>, vector<1x1xf32>
      tpu.vector_store %arg6[%c0_20, %c0_21], %31 {strides = array<i32>} : memref<1x1xf32, #tpu.memory_space<vmem>>, vector<1x1xf32>,
      %c0_22 = arith.constant 0 : index
      %c0_23 = arith.constant 0 : index
      %33 = vector.load %arg2[%c0_22, %c0_23] : memref<1x128xf32, #tpu.memory_space<vmem>>, vector<1x128xf32>
      %34 = vector.shape_cast %33 : vector<1x128xf32> to vector<1x1x128xf32>
      %cst_24 = arith.constant dense<0xFF800000> : vector<1xf32>
      %35 = vector.multi_reduction <maximumf>, %34, %cst_24 [1, 2] : vector<1x1x128xf32> to vector<1xf32>
      %36 = vector.shape_cast %35 : vector<1xf32> to vector<1x1x1xf32>
      %37 = vector.extract %36[0, 0, 0] : f32 from vector<1x1x1xf32>
      %38 = vector.broadcast %37 : f32 to vector<1x1xf32>
      %c0_25 = arith.constant 0 : index
      %c0_26 = arith.constant 0 : index
      %39 = vector.load %arg8[%c0_25, %c0_26] : memref<1x1xf32, #tpu.memory_space<vmem>>, vector<1x1xf32>
      tpu.vector_store %arg8[%c0_25, %c0_26], %38 {strides = array<i32>} : memref<1x1xf32, #tpu.memory_space<vmem>>, vector<1x1xf32>,
      %40 = vector.broadcast %37 : f32 to vector<1x128xf32>
      %41 = arith.subf %33, %40 : vector<1x128xf32>
      %42 = math.exp %41 : vector<1x128xf32>
      %c0_27 = arith.constant 0 : index
      %c0_28 = arith.constant 0 : index
      %43 = vector.load %arg7[%c0_27, %c0_28] : memref<1x128xf32, #tpu.memory_space<vmem>>, vector<1x128xf32>
      tpu.vector_store %arg7[%c0_27, %c0_28], %42 {strides = array<i32>} : memref<1x128xf32, #tpu.memory_space<vmem>>, vector<1x128xf32>,
    } else {
    }
    %c0 = arith.constant 0 : index
    %c0_1 = arith.constant 0 : index
    %3 = vector.load %arg8[%c0, %c0_1] : memref<1x1xf32, #tpu.memory_space<vmem>>, vector<1x1xf32>
    %c0_2 = arith.constant 0 : index
    %c0_3 = arith.constant 0 : index
    %4 = vector.load %arg7[%c0_2, %c0_3] : memref<1x128xf32, #tpu.memory_space<vmem>>, vector<1x128xf32>
    %c0_4 = arith.constant 0 : index
    %c0_5 = arith.constant 0 : index
    %5 = vector.load %arg1[%c0_4, %c0_5] : memref<128x1xf32, #tpu.memory_space<vmem>>, vector<128x1xf32>
    %c0_6 = arith.constant 0 : index
    %c0_7 = arith.constant 0 : index
    %6 = vector.load %arg4[%c0_6, %c0_7] : memref<1x128xf32, #tpu.memory_space<vmem>>, vector<1x128xf32>
    %7 = vector.broadcast %5 : vector<128x1xf32> to vector<128x128xf32>
    %8 = vector.broadcast %6 : vector<1x128xf32> to vector<128x128xf32>
    %9 = arith.cmpf oge, %7, %8 : vector<128x128xf32>
    %10 = arith.extui %9 : vector<128x128xi1> to vector<128x128xi32>
    %11 = arith.sitofp %10 : vector<128x128xi32> to vector<128x128xf32>
    %cst = arith.constant dense<0.000000e+00> : vector<1x128xf32>
    %12 = tpu.matmul %4, %11, %cst {dimension_numbers = #tpu.dot_dimension_numbers<[1], [0], [0], [1], [0, 0, 1, 1], [], []>} : vector<1x128xf32>, vector<128x128xf32>, vector<1x128xf32> -> vector<1x128xf32>
    %13 = math.log %12 : vector<1x128xf32>
    %c0_8 = arith.constant 0 : index
    %c0_9 = arith.constant 0 : index
    %14 = vector.load %arg3[%c0_8, %c0_9] : memref<1x128xf32, #tpu.memory_space<vmem>>, vector<1x128xf32>
    %c0_10 = arith.constant 0 : index
    %c0_11 = arith.constant 0 : index
    %15 = vector.load %arg5[%c0_10, %c0_11] : memref<1x128xf32, #tpu.memory_space<vmem>>, vector<1x128xf32>
    %cst_12 = arith.constant 5.000000e-01 : f32
    %16 = vector.broadcast %cst_12 : f32 to vector<1x128xf32>
    %17 = arith.cmpf ogt, %15, %16 : vector<1x128xf32>
    %18 = vector.broadcast %3 : vector<1x1xf32> to vector<1x128xf32>
    %19 = arith.subf %14, %18 : vector<1x128xf32>
    %20 = arith.subf %19, %13 : vector<1x128xf32>
    %cst_13 = arith.constant 0.000000e+00 : f32
    %21 = vector.broadcast %cst_13 : f32 to vector<1x128xf32>
    %22 = arith.select %17, %20, %21 : vector<1x128xi1>, vector<1x128xf32>
    %c0_14 = arith.constant 0 : index
    %c0_15 = arith.constant 0 : index
    %23 = vector.load %arg6[%c0_14, %c0_15] : memref<1x1xf32, #tpu.memory_space<vmem>>, vector<1x1xf32>
    %24 = vector.shape_cast %22 : vector<1x128xf32> to vector<1x1x128xf32>
    %cst_16 = arith.constant dense<0.000000e+00> : vector<1xf32>
    %25 = vector.multi_reduction <add>, %24, %cst_16 [1, 2] : vector<1x1x128xf32> to vector<1xf32>
    %26 = vector.shape_cast %25 : vector<1xf32> to vector<1x1x1xf32>
    %27 = vector.extract %26[0, 0, 0] : f32 from vector<1x1x1xf32>
    %28 = vector.broadcast %27 : f32 to vector<1x1xf32>
    %29 = arith.addf %23, %28 : vector<1x1xf32>
    %c0_17 = arith.constant 0 : index
    %c0_18 = arith.constant 0 : index
    %30 = vector.load %arg6[%c0_17, %c0_18] : memref<1x1xf32, #tpu.memory_space<vmem>>, vector<1x1xf32>
    tpu.vector_store %arg6[%c0_17, %c0_18], %29 {strides = array<i32>} : memref<1x1xf32, #tpu.memory_space<vmem>>, vector<1x1xf32>,
    return
  }
  func.func @transform_0(%arg0: i32) -> (i32, i32) {
    %c0_i32 = arith.constant 0 : i32
    %c0_i32_0 = arith.constant 0 : i32
    %c0_i32_1 = arith.constant 0 : i32
    return %c0_i32, %c0_i32_0 : i32, i32
  }
  func.func @transform_1(%arg0: i32) -> (i32, i32) {
    %c0_i32 = arith.constant 0 : i32
    %c0_i32_0 = arith.constant 0 : i32
    %c0_i32_1 = arith.constant 0 : i32
    return %c0_i32, %c0_i32_0 : i32, i32
  }
  func.func @transform_2(%arg0: i32) -> (i32, i32) {
    %c0_i32 = arith.constant 0 : i32
    %c0_i32_0 = arith.constant 0 : i32
    return %c0_i32, %arg0 : i32, i32
  }
  func.func @transform_3(%arg0: i32) -> (i32, i32) {
    %c0_i32 = arith.constant 0 : i32
    %c0_i32_0 = arith.constant 0 : i32
    return %c0_i32, %arg0 : i32, i32
  }
  func.func @transform_4(%arg0: i32) -> (i32, i32) {
    %c0_i32 = arith.constant 0 : i32
    %c0_i32_0 = arith.constant 0 : i32
    return %c0_i32, %arg0 : i32, i32
  }
  func.func @transform_5(%arg0: i32) -> (i32, i32) {
    %c0_i32 = arith.constant 0 : i32
    %c0_i32_0 = arith.constant 0 : i32
    %c0_i32_1 = arith.constant 0 : i32
    return %c0_i32, %c0_i32_0 : i32, i32
  }
}

</mosaic_0001>

<bundles_post_ra>
// kernel: survival_loss.1
= control target key start
LH: loop header
LB: loop body
LE: loop exit
PB: predicated region body
PF: predicated region fallthrough
CT: control target
= control target key end

     0   :  { %vm28_vm0 = vcmask 1040384   ;;  %v335_v2 = vmov 0   ;;  %s441_s0 = inlined_call_operand.vmem [shape: f32[128,1], index: 0, kind: input, shape index: {}]   ;;  %s442_s1 = inlined_call_operand.vmem [shape: f32[1,128], index: 1, kind: input, shape index: {}, may-alias: {1,2}]   ;;  %s443_s2 = inlined_call_operand.vmem [shape: f32[1,128], index: 2, kind: input, shape index: {}, may-alias: {1,2}]   ;;  %s444_s3 = inlined_call_operand.vmem [shape: f32[1,128], index: 3, kind: input, shape index: {}]   ;;  %s445_s4 = inlined_call_operand.vmem [shape: f32[1,128], index: 4, kind: input, shape index: {}]   ;;  %s446_s5 = inlined_call_operand.hbm [shape: f32[1,1], index: 5, kind: output, shape index: {}]  }
   0x1   :  { %v61_v0 = vld [vmem:[%s441_s0 + $0x70] sm:$0xff]  ;;  %v375_v1 = vld [vmem:[%s442_s1] sm:$0x1]  ;;  %302 = vset.pattern.permute.xlu1 %v335_v2  ;;  %303 = vset.pattern.permute.xlu2 %v335_v2 }
   0x2   :  { %v29_v3 = vsel %vm28_vm0, %v375_v1, -inf  ;;  %v59_v4 = vld [vmem:[%s441_s0 + $0x60] sm:$0xff]  ;;  %136 = vperm.xlu1 %302, %v61_v0   ;;  %301 = vset.pattern.permute.xlu0 %v335_v2 }
   0x3   :  { %30 = vmax.xlane.f32.xlu0 %v29_v3  ;;  %126 = vperm.xlu2 %303, %v59_v4  }
   0x4   :  { %10 = vsyncpa [#allocation5], 0  ;;  %v60_v5 = vld [vmem:[%s441_s0 + $0x68] sm:$0xff]  ;;  %v58_v6 = vld [vmem:[%s441_s0 + $0x58] sm:$0xff]  ;;  %vm25_vm1 = vcmask 0   ;;  %v336_v35 = vmov 0.0  }
   0x5   :  { %v57_v7 = vld [vmem:[%s441_s0 + $0x50] sm:$0xff]  ;;  %v56_v8 = vld [vmem:[%s441_s0 + $0x48] sm:$0xff]  ;;  %v62_v9 = vld [vmem:[%s441_s0 + $0x78] sm:$0xff]  ;;  %26 = vst.msk [vmem:[#allocation4] sm:$0x1] %vm25_vm1, %v336_v35  ;;  %v337_v36 = vmov 1.0  }
   0x6   :  { %v55_v10 = vld [vmem:[%s441_s0 + $0x40] sm:$0xff]  ;;  %v54_v11 = vld [vmem:[%s441_s0 + $0x38] sm:$0xff]  ;;  %v49_v12 = vld [vmem:[%s441_s0 + $0x10] sm:$0xff]  ;;  %s252_s7 = sshll.u32 %s446_s5, 4  ;;  %s253_s7 = int_to_ptr.hbm [resolvable:$true] %s252_s7 }
   0x7   :  { %v53_v13 = vld [vmem:[%s441_s0 + $0x30] sm:$0xff]  ;;  %v52_v14 = vld [vmem:[%s441_s0 + $0x28] sm:$0xff]  ;;  %v51_v15 = vld [vmem:[%s441_s0 + $0x20] sm:$0xff] }
   0x8   :  { %v50_v16 = vld [vmem:[%s441_s0 + $0x18] sm:$0xff]  ;;  %v48_v17 = vld [vmem:[%s441_s0 + $0x8] sm:$0xff]  ;;  %v47_v18 = vld [vmem:[%s441_s0] sm:$0xff] }
   0x9   :  { %v304_v32 = vld [vmem:[%s444_s3] ss:$0 sm:$0xff] }
   0xa   :  { %131 = vperm.xlu1 %302, %v60_v5   ;;  %v217_v54 = vld [vmem:[%s443_s2] sm:$0x1]  ;;  %s338_s2 = smov [#allocation4]  }
   0xb   :  { %121 = vperm.xlu2 %303, %v58_v6   ;;  %v218_v55 = vld [vmem:[%s445_s4] sm:$0x1]  ;;  %s250_s4 = sshll.u32 %s338_s2, 4  ;;  %s251_s4 = int_to_ptr.vmem [resolvable:$true] %s250_s4 }
   0xc   :  { %v229_v5 = vld [vmem:[#allocation4] sm:$0x1] }
  0x12   :  { %116 = vperm.xlu1 %302, %v57_v7  }
  0x13   :  { %111 = vperm.xlu2 %303, %v56_v8  }
  0x17   :  { %141 = vperm.xlu0 %301, %v62_v9  }
  0x1a   :  { %106 = vperm.xlu1 %302, %v55_v10  }
  0x1b   :  { %101 = vperm.xlu2 %303, %v54_v11  }
  0x1f   :  { %76 = vperm.xlu0 %301, %v49_v12  }
  0x22   :  { %96 = vperm.xlu1 %302, %v53_v13  }
  0x23   :  { %91 = vperm.xlu2 %303, %v52_v14  }
  0x2a   :  { %86 = vperm.xlu1 %302, %v51_v15  }
  0x2b   :  { %81 = vperm.xlu2 %303, %v50_v16  }
  0x32   :  { %71 = vperm.xlu1 %302, %v48_v17  }
  0x33   :  { %66 = vperm.xlu2 %303, %v47_v18  }
  0x5d   :  { %v127_v19 = vpop.permute.xlu2 %126 }
  0x5e   :  { %vm159_vm5 = vcmp.ge.f32.partialorder %v127_v19, %v304_v32 }
  0x65   :  { %v122_v20 = vpop.permute.xlu2 %121 }
  0x66   :  { %vm158_vm6 = vcmp.ge.f32.partialorder %v122_v20, %v304_v32 }
  0x6d   :  { %v112_v26 = vpop.permute.xlu2 %111 }
  0x6e   :  { %vm156_vm8 = vcmp.ge.f32.partialorder %v112_v26, %v304_v32 }
  0x74   :  { %v137_v21 = vpop.permute.xlu1 %136 }
  0x75   :  { %v102_v33 = vpop.permute.xlu2 %101  ;;  %vm161_vm2 = vcmp.ge.f32.partialorder %v137_v21, %v304_v32 }
  0x76   :  { %v31_v22 = vpop.xlane.xlu0 %30  ;;  %vm154_vm10 = vcmp.ge.f32.partialorder %v102_v33, %v304_v32 }
  0x77   :  { %v32_v23 = vrot.slane %v31_v22, 4 }
  0x79   :  { %v33_v24 = vmax.f32 %v31_v22, %v32_v23 }
  0x7b   :  { %v34_v25 = vrot.slane %v33_v24, 2 }
  0x7c   :  { %v132_v27 = vpop.permute.xlu1 %131 }
  0x7d   :  { %v35_v28 = vmax.f32 %v33_v24, %v34_v25  ;;  %vm160_vm4 = vcmp.ge.f32.partialorder %v132_v27, %v304_v32  ;;  %v92_v38 = vpop.permute.xlu2 %91 }
  0x7e   :  { %vm152_vm12 = vcmp.ge.f32.partialorder %v92_v38, %v304_v32 }
  0x7f   :  { %v36_v29 = vrot.slane %v35_v28, 1 }
  0x81   :  { %v37_v30 = vmax.f32 %v35_v28, %v36_v29 }
  0x83   :  { %293 = vpush %v37_v30 }
  0x84   :  { %v117_v31 = vpop.permute.xlu1 %116 }
  0x85   :  { %vm157_vm7 = vcmp.ge.f32.partialorder %v117_v31, %v304_v32  ;;  %v82_v40 = vpop.permute.xlu2 %81 }
  0x86   :  { %vm150_vm14 = vcmp.ge.f32.partialorder %v82_v40, %v304_v32 }
  0x89   :  { %v142_v34 = vpop.permute.xlu0 %141 }
  0x8a   :  { %vm162_vm3 = vcmp.ge.f32.partialorder %v142_v34, %v304_v32 }
  0x8b   :  { %277 = vmatpush.msk.msra.mxu0 %vm162_vm3, %v337_v36 }
  0x8c   :  { %v107_v37 = vpop.permute.xlu1 %106 }
  0x8d   :  { %278 = vmatpush.msk.msra.mxu0 %vm161_vm2, %v337_v36  ;;  %vm155_vm9 = vcmp.ge.f32.partialorder %v107_v37, %v304_v32  ;;  %v67_v43 = vpop.permute.xlu2 %66 }
  0x8e   :  { %vm147_vm3 = vcmp.ge.f32.partialorder %v67_v43, %v304_v32 }
  0x8f   :  { %279 = vmatpush.msk.msra.mxu0 %vm160_vm4, %v337_v36  ;;  %vm219_vm4 = vcmp.gt.f32.partialorder %v218_v55, 0.5 }
  0x91   :  { %280 = vmatpush.msk.msra.mxu0 %vm159_vm5, %v337_v36  ;;  %v77_v42 = vpop.permute.xlu0 %76 }
  0x92   :  { %vm149_vm15 = vcmp.ge.f32.partialorder %v77_v42, %v304_v32 }
  0x93   :  { %281 = vmatpush.msk.msra.mxu0 %vm158_vm6, %v337_v36 }
  0x94   :  { %v97_v39 = vpop.permute.xlu1 %96 }
  0x95   :  { %282 = vmatpush.msk.msra.mxu0 %vm157_vm7, %v337_v36  ;;  %vm153_vm11 = vcmp.ge.f32.partialorder %v97_v39, %v304_v32 }
  0x97   :  { %283 = vmatpush.msk.msra.mxu0 %vm156_vm8, %v337_v36 }
  0x99   :  { %284 = vmatpush.msk.msra.mxu0 %vm155_vm9, %v337_v36 }
  0x9b   :  { %285 = vmatpush.msk.msra.mxu0 %vm154_vm10, %v337_v36 }
  0x9c   :  { %v87_v41 = vpop.permute.xlu1 %86 }
  0x9d   :  { %286 = vmatpush.msk.msra.mxu0 %vm153_vm11, %v337_v36  ;;  %vm151_vm13 = vcmp.ge.f32.partialorder %v87_v41, %v304_v32 }
  0x9f   :  { %287 = vmatpush.msk.msra.mxu0 %vm152_vm12, %v337_v36 }
  0xa1   :  { %288 = vmatpush.msk.msra.mxu0 %vm151_vm13, %v337_v36 }
  0xa3   :  { %289 = vmatpush.msk.msra.mxu0 %vm150_vm14, %v337_v36 }
  0xa4   :  { %v72_v44 = vpop.permute.xlu1 %71 }
  0xa5   :  { %290 = vmatpush.msk.msra.mxu0 %vm149_vm15, %v337_v36  ;;  %vm148_vm2 = vcmp.ge.f32.partialorder %v72_v44, %v304_v32 }
  0xa7   :  { %291 = vmatpush.msk.msra.mxu0 %vm148_vm2, %v337_v36 }
  0xa9   :  { %292 = vmatpush.msk.msra.mxu0 %vm147_vm3, %v337_v36 }
  0xb4   :  { %s294_s0 = spop %293 }
  0xb5   :  { %v39_v45 = vstv %s294_s0 }
  0xb6   :  { %40 = vst.msk [vmem:[#allocation3] sm:$0x1] %vm25_vm1, %v39_v45  ;;  %v41_v46 = vsub.f32 %v375_v1, %v39_v45 }
  0xb8   :  { %v42_v47 = vmul.f32 1.442695, %v41_v46 }
  0xba   :  { %305 = vpow2.f32 %v42_v47 }
  0xbd   :  { %v45_v48 = vld [vmem:[#allocation3] sm:$0x1] }
  0xbe   :  { %222 = vperm.xlu0 %301, %v45_v48  }
  0xc0   :  { %v306_v49 = vpop.eup %305 }
  0xc1   :  { %44 = vst [vmem:[#allocation2] sm:$0x1] %v306_v49 }
  0xc8   :  { %v46_v50 = vld [vmem:[#allocation2] sm:$0x1] }
  0xc9   :  { %211 = vmatmul.f32.vlgmr.msra.gmra.mxu0 %v46_v50 }
 0x130   :  { %v223_v52 = vpop.permute.xlu0 %222 }
 0x131   :  { %v225_v53 = vperm.slane %v223_v52, 0 }
 0x133   :  { %v226_v57 = vsub.f32 %v217_v54, %v225_v53 }
 0x146   :  { %v212_v51 = vpop.f32.mrf.mxu0 }
 0x147   :  { %307 = vlog2.f32 %v212_v51 }
 0x14d   :  { %v308_v56 = vpop.eup %307 }
 0x14e   :  { %v216_v58 = vmul.f32 0.6931472, %v308_v56 }
 0x150   :  { %v227_v59 = vsub.f32 %v226_v57, %v216_v58 }
 0x152   :  { %v228_v60 = vsel %vm219_vm4, %v227_v59, 0.0 }
 0x153   :  { %v231_v61 = vsel %vm28_vm0, %v228_v60, 0.0 }
 0x154   :  { %232 = vadd.xlane.f32.xlu1 %v231_v61 }
 0x1c7   :  { %v233_v62 = vpop.xlane.xlu1 %232 }
 0x1c8   :  { %v234_v63 = vrot.slane %v233_v62, 4 }
 0x1ca   :  { %v235_v0 = vadd.f32 %v234_v63, %v233_v62 }
 0x1cc   :  { %v236_v1 = vrot.slane %v235_v0, 2 }
 0x1ce   :  { %v237_v2 = vadd.f32 %v236_v1, %v235_v0 }
 0x1d0   :  { %v238_v3 = vrot.slane %v237_v2, 1 }
 0x1d2   :  { %v239_v4 = vadd.f32 %v238_v3, %v237_v2 }
 0x1d4   :  { %295 = vpush %v239_v4 }
 0x205   :  { %s296_s8 = spop %295 }
 0x206   :  { %v241_v6 = vstv %s296_s8 }
 0x207   :  { %v242_v7 = vadd.f32 %v241_v6, %v229_v5 }
 0x209   :  { %244 = vst.msk [vmem:[#allocation4] sm:$0x1] %vm25_vm1, %v242_v7 }
 0x20a   :  { %255 = dma.vmem_to_hbm [thread:$0]  %s251_s4, 16, %s253_s7, [#allocation5]  }
 0x20b   :  { %333 = dma.done.wait [#allocation5], 16  }
 0x20c   :  { %334 = vsyncadd [#allocation5], 4294967280 }
 0x20d   :  { %260 = vsyncpa [#allocation5], 1 }

</bundles_post_ra>
